<compile_context>
chip_gen: v5e
topology: v5e:2x2
jax: 0.10.0
libtpu: 0.0.40
codegen_flags: <defaults>
</compile_context>

<pallas_src>
import jax
import jax.numpy as jnp
import numpy as np
from jax.experimental import pallas as pl
from jax.experimental.pallas import tpu as pltpu


# ---------------------------------------------------------------------------
# Dense Pallas pass: no-object confidence BCE over all B*A*G*G cells.
# ---------------------------------------------------------------------------
def _noobj_bce_kernel(conf_ref, mask_ref, out_ref):
    # conf_ref: (ba_tile, 1, G, G) raw confidence logits (channel 4 of pred)
    # mask_ref: (ba_tile, G, G)    no-object mask (0.0 / 1.0)
    # out_ref : (1, 8, 128)        per-step partial sum (scalar broadcast)
    z = conf_ref[...][:, 0, :, :]
    m = mask_ref[...]
    # BCE(sigmoid(z), 0) = -log(1 - sigmoid(z)) = softplus(z); the -100 log
    # clamp of F.binary_cross_entropy folds into min(softplus, 100).
    sp = jnp.maximum(z, 0.0) + jnp.log(1.0 + jnp.exp(-jnp.abs(z)))
    s = jnp.sum(m * jnp.minimum(sp, 100.0))
    out_ref[...] = s * jnp.ones((1, 8, 128), jnp.float32)


def _vmem_budget_bytes():
    # Keep the double-buffered working set far inside the scoped-VMEM default
    # on every generation (v5e/v6e: 128 MiB physical, v7x: 64 MiB per TC).
    try:
        vmem = pltpu.get_tpu_info().vmem_capacity_bytes
    except Exception:  # pragma: no cover - conservative fallback
        vmem = 64 << 20
    return max(256 << 10, min(4 << 20, vmem // 32))


def _pick_slab_tile(n_slabs, slab_bytes, budget_bytes):
    """Largest divisor of n_slabs whose per-step block stays under the budget."""
    best = 1
    for d in range(1, n_slabs + 1):
        if n_slabs % d == 0 and d * slab_bytes <= budget_bytes:
            best = d
    return best


def _noobj_conf_loss(pred_slabs, noobj_mask, grid_size):
    # pred_slabs: (B*A, 5+C, G, G) raw logits (free, contiguous reshape of pred)
    # noobj_mask: (B*A, G, G) float32
    n_slabs = pred_slabs.shape[0]
    G = grid_size
    slab_bytes = G * G * 4 * 2  # conf + mask, f32
    ba_tile = _pick_slab_tile(n_slabs, slab_bytes, _vmem_budget_bytes())
    num_steps = n_slabs // ba_tile

    cells = n_slabs * G * G
    cost = pl.CostEstimate(
        flops=int(cells * 6),
        transcendentals=int(cells * 2),
        bytes_accessed=int(cells * 8 + num_steps * 8 * 128 * 4),
    )

    partials = pl.pallas_call(
        _noobj_bce_kernel,
        out_shape=jax.ShapeDtypeStruct((num_steps, 8, 128), jnp.float32),
        grid=(num_steps,),
        in_specs=[
            # Strided read of only the confidence channel (attribute index 4):
            # no channel-major relayout of pred is ever built.
            pl.BlockSpec((ba_tile, 1, G, G), lambda i: (i, 4, 0, 0)),
            pl.BlockSpec((ba_tile, G, G), lambda i: (i, 0, 0)),
        ],
        out_specs=pl.BlockSpec((1, 8, 128), lambda i: (i, 0, 0)),
        compiler_params=pltpu.CompilerParams(
            # TODO(synk): on v7x, CORE_PARALLEL / core_map over the slab axis
            # would engage both TensorCores; "parallel" is kept for portability.
            dimension_semantics=("parallel",)),
        cost_estimate=cost,
    )(pred_slabs, noobj_mask)
    return jnp.sum(partials[:, 0, 0])


# ---------------------------------------------------------------------------
# Vectorized target assignment (plain-JAX glue; O(B*T) work, data dependent).
# ---------------------------------------------------------------------------
def _assign_targets(target, scaled_anchors, num_anchors, grid_size,
                    ignore_thresh, truth_thresh):
    f32 = jnp.float32
    B, T = target.shape[0], target.shape[1]
    A, G = num_anchors, grid_size

    valid = jnp.sum(target, axis=-1) != 0.0                    # (B, T)
    gx = target[..., 1] * G
    gy = target[..., 2] * G
    gw = target[..., 3] * G
    gh = target[..., 4] * G
    gi = gx.astype(jnp.int32)                                  # trunc like int()
    gj = gy.astype(jnp.int32)
    cls_idx = target[..., 0].astype(jnp.int32)

    # Anchor IoU with the reference's +1-pixel box convention: (B, T, A).
    aw = scaled_anchors[:, 0]
    ah = scaled_anchors[:, 1]
    inter = (jnp.maximum(jnp.minimum(gw[..., None], aw) + 1.0, 0.0)
             * jnp.maximum(jnp.minimum(gh[..., None], ah) + 1.0, 0.0))
    area_t = (gw + 1.0) * (gh + 1.0)
    area_a = (aw + 1.0) * (ah + 1.0)
    iou = inter / (area_t[..., None] + area_a - inter + 1e-16)

    best_n = jnp.argmax(iou, axis=-1).astype(jnp.int32)        # first max == '>' loop
    best_iou = jnp.max(iou, axis=-1)

    cond_obj = valid & (best_iou > truth_thresh)
    cond_clear = (valid & (best_iou > ignore_thresh)) | cond_obj

    # TODO(synk): coordinates exactly at 1.0 give gi/gj == G; PyTorch would
    # raise an IndexError there, here the indices are clamped into the grid.
    gi_c = jnp.clip(gi, 0, G - 1)
    gj_c = jnp.clip(gj, 0, G - 1)

    # No-object mask via an order-independent min-scatter (no dummy slot).
    bidx = jnp.broadcast_to(jnp.arange(B, dtype=jnp.int32)[:, None], (B, T))
    clear_val = jnp.where(cond_clear, 0.0, 1.0).astype(f32)
    noobj = jnp.ones((B, A, G, G), f32).at[bidx, best_n, gj_c, gi_c].min(clear_val)

    # Last-target-wins de-duplication for positive cells (matches the PyTorch
    # sequential loop when several targets pick the same (b, n, gj, gi) cell).
    cell = (best_n * G + gj_c) * G + gi_c                      # (B, T)
    t_idx = jnp.arange(T)
    later = t_idx[None, :] > t_idx[:, None]                    # (T, T)
    same = cell[:, :, None] == cell[:, None, :]                # (B, T, T)
    overwritten = jnp.any(same & later[None, :, :] & cond_obj[:, None, :], axis=-1)
    winner = cond_obj & ~overwritten                           # (B, T)

    # Per-target regression targets.
    tx = gx - gi.astype(f32)
    ty = gy - gj.astype(f32)
    tw = jnp.log(gw / aw[best_n] + 1e-16)
    th = jnp.log(gh / ah[best_n] + 1e-16)

    return dict(noobj=noobj, winner=winner, best_n=best_n, gi=gi_c, gj=gj_c,
                tx=tx, ty=ty, tw=tw, th=th, cls_idx=cls_idx, bidx=bidx)


def _clamped_softplus(z):
    sp = jnp.maximum(z, 0.0) + jnp.log(1.0 + jnp.exp(-jnp.abs(z)))
    return jnp.minimum(sp, 100.0)


# ---------------------------------------------------------------------------
# Forward pass (mirrors YOLOv3LossOriginal.forward).
# ---------------------------------------------------------------------------
def yolo_v3_loss(pred, target, anchors, num_anchors, grid_size, *, num_classes,
                 ignore_thresh=0.5, truth_thresh=1.0, object_scale=5.0,
                 noobject_scale=1.0, class_scale=1.0, coord_scale=1.0):
    f32 = jnp.float32
    pred = pred.astype(f32)
    target = target.astype(f32)

    B = pred.shape[0]
    stride = grid_size // pred.shape[2]
    A, G, C = num_anchors, grid_size, num_classes
    attrs = 5 + C
    assert pred.shape[1] == A * attrs

    scaled_anchors = jnp.asarray(
        [(aw / stride, ah / stride) for aw, ah in anchors], f32)

    tg = _assign_targets(target, scaled_anchors, A, G, ignore_thresh, truth_thresh)

    # ---- dense Pallas pass: no-object conf BCE over every cell -------------
    pred_slabs = pred.reshape(B * A, attrs, G, G)     # free, contiguous reshape
    noobj_sum = _noobj_conf_loss(pred_slabs, tg["noobj"].reshape(B * A, G, G), G)

    # ---- sparse pass: obj cells (<= B*T), plain-JAX gather ------------------
    GG = G * G
    base = ((tg["bidx"] * (A * attrs) + tg["best_n"] * attrs) * GG
            + tg["gj"] * G + tg["gi"])                               # (B, T)
    idx = base[..., None] + jnp.arange(attrs, dtype=jnp.int32) * GG  # (B, T, attrs)
    z = jnp.take(pred.reshape(-1), idx)                              # (B, T, attrs)

    w = tg["winner"].astype(f32)
    coord = ((jax.nn.sigmoid(z[..., 0]) - tg["tx"]) ** 2
             + (jax.nn.sigmoid(z[..., 1]) - tg["ty"]) ** 2
             + (z[..., 2] - tg["tw"]) ** 2
             + (z[..., 3] - tg["th"]) ** 2)
    conf_obj = _clamped_softplus(-z[..., 4])          # BCE(sigmoid(z), 1)

    coord_sum = jnp.sum(w * coord)
    obj_sum = jnp.sum(w * conf_obj)

    if C > 0:
        onehot = (jnp.arange(C, dtype=jnp.int32)[None, None, :]
                  == tg["cls_idx"][..., None])
        cls_bce = jnp.sum(jnp.where(onehot, _clamped_softplus(-z[..., 5:]),
                                    _clamped_softplus(z[..., 5:])), axis=-1)
        cls_sum = jnp.sum(w * cls_bce)
    else:
        cls_sum = jnp.asarray(0.0, f32)

    return (coord_scale * coord_sum + object_scale * obj_sum
            + noobject_scale * noobj_sum + class_scale * cls_sum)


# ---------------------------------------------------------------------------
# Independent NumPy port of the PyTorch module (explicit loops) for validation.
# ---------------------------------------------------------------------------
def _reference_loss_numpy(pred, target, anchors, num_anchors, grid_size, *,
                          num_classes, ignore_thresh=0.5, truth_thresh=1.0,
                          object_scale=5.0, noobject_scale=1.0, class_scale=1.0,
                          coord_scale=1.0):
    pred = np.asarray(pred, np.float64)
    target = np.asarray(target, np.float64)
    B = pred.shape[0]
    stride = grid_size // pred.shape[2]
    A, G, C = num_anchors, grid_size, num_classes
    attrs = 5 + C
    p = pred.reshape(B, A, attrs, G, G).transpose(0, 1, 3, 4, 2)

    def sig(v):
        return 1.0 / (1.0 + np.exp(-v))

    x, y = sig(p[..., 0]), sig(p[..., 1])
    w, h = p[..., 2], p[..., 3]
    conf = sig(p[..., 4])
    pcls = sig(p[..., 5:])
    scaled = [(aw / stride, ah / stride) for aw, ah in anchors]

    obj = np.zeros((B, A, G, G), bool)
    noobj = np.ones((B, A, G, G), bool)
    tx = np.zeros((B, A, G, G)); ty = np.zeros((B, A, G, G))
    tw = np.zeros((B, A, G, G)); th = np.zeros((B, A, G, G))
    tconf = np.zeros((B, A, G, G)); tcls = np.zeros((B, A, G, G, C))

    def iou_wh(gw, gh, aw, ah):
        inter = max(min(gw, aw) + 1.0, 0.0) * max(min(gh, ah) + 1.0, 0.0)
        return inter / ((gw + 1.0) * (gh + 1.0) + (aw + 1.0) * (ah + 1.0)
                        - inter + 1e-16)

    for b in range(B):
        for t in range(target.shape[1]):
            if target[b, t].sum() == 0:
                continue
            gx, gy = target[b, t, 1] * G, target[b, t, 2] * G
            gw, gh = target[b, t, 3] * G, target[b, t, 4] * G
            gi, gj = int(gx), int(gy)
            best_n, best_iou = -1, 0.0
            for n in range(A):
                iou = iou_wh(gw, gh, scaled[n][0], scaled[n][1])
                if iou > best_iou:
                    best_iou, best_n = iou, n
            if best_iou > ignore_thresh:
                noobj[b, best_n, gj, gi] = False
            if best_iou > truth_thresh:
                obj[b, best_n, gj, gi] = True
                noobj[b, best_n, gj, gi] = False
                tx[b, best_n, gj, gi] = gx - gi
                ty[b, best_n, gj, gi] = gy - gj
                tw[b, best_n, gj, gi] = np.log(gw / scaled[best_n][0] + 1e-16)
                th[b, best_n, gj, gi] = np.log(gh / scaled[best_n][1] + 1e-16)
                tconf[b, best_n, gj, gi] = 1.0
                tcls[b, best_n, gj, gi, int(target[b, t, 0])] = 1.0

    def bce(p_, t_):
        return -(t_ * np.maximum(np.log(p_), -100.0)
                 + (1.0 - t_) * np.maximum(np.log(1.0 - p_), -100.0))

    loss = (coord_scale * (np.sum((x[obj] - tx[obj]) ** 2)
                           + np.sum((y[obj] - ty[obj]) ** 2)
                           + np.sum((w[obj] - tw[obj]) ** 2)
                           + np.sum((h[obj] - th[obj]) ** 2))
            + object_scale * np.sum(bce(conf[obj], tconf[obj]))
            + noobject_scale * np.sum(bce(conf[noobj], tconf[noobj]))
            + class_scale * np.sum(bce(pcls[obj], tcls[obj])))
    return float(loss)


# ---------------------------------------------------------------------------
if __name__ == "__main__":
    key = jax.random.PRNGKey(0)
    k_pred, k_cls, k_xy, k_wh = jax.random.split(key, 4)

    B, A, C, G, T = 2, 3, 4, 8, 4
    attrs = 5 + C

    # Raw network output, NCHW: (B, A*(5+C), G, G)
    pred = jax.random.normal(k_pred, (B, A * attrs, G, G), jnp.float32)

    # Targets: (B, T, 5) = [class, x, y, w, h], normalized coordinates.
    tcls_id = jax.random.randint(k_cls, (B, T, 1), 0, C).astype(jnp.float32)
    xy = jax.random.uniform(k_xy, (B, T, 2), jnp.float32, 0.1, 0.9)
    wh = jax.random.uniform(k_wh, (B, T, 2), jnp.float32, 0.3, 0.7)
    target = jnp.concatenate([tcls_id, xy, wh], axis=-1)

    # Force a same-cell collision (exercises last-target-wins de-duplication)
    # and an all-zero (padding) target row.
    target = target.at[0, 1, 1:3].set(target[0, 0, 1:3])
    target = target.at[0, 1, 3:5].set(target[0, 0, 3:5] * 1.05)
    target = target.at[1, 3].set(0.0)

    anchors = [(2.0, 2.0), (4.0, 4.0), (6.0, 6.0)]

    # Note: the module default truth_thresh=1.0 makes the obj mask empty (IoU
    # never strictly exceeds 1); lower thresholds exercise every loss term.
    kwargs = dict(num_classes=C, ignore_thresh=0.25, truth_thresh=0.25,
                  object_scale=5.0, noobject_scale=1.0, class_scale=1.0,
                  coord_scale=1.0)

    loss = jax.block_until_ready(
        yolo_v3_loss(pred, target, anchors, A, G, **kwargs))

    ref = _reference_loss_numpy(np.asarray(pred), np.asarray(target), anchors,
                                A, G, **kwargs)
    rel_err = abs(float(loss) - ref) / max(abs(ref), 1.0)
    assert rel_err < 1e-3, (float(loss), ref, rel_err)

    print("KERNEL_OK")
</pallas_src>

<mosaic_0001>
module attributes {stable_mosaic.version = 11 : i64} {
  func.func @_noobj_bce_kernel(%arg0: i32, %arg1: memref<6x1x8x8xf32, #tpu.memory_space<vmem>>, %arg2: memref<6x8x8xf32, #tpu.memory_space<vmem>>, %arg3: memref<1x8x128xf32, #tpu.memory_space<vmem>>) attributes {dimension_semantics = [#tpu.dimension_semantics<parallel>], iteration_bounds = array<i64: 1>, scalar_prefetch = 0 : i64, scratch_operands = 0 : i64, tpu.core_type = #tpu.core_type<tc>, window_params = [{transform_indices = @transform_0, window_bounds = array<i64: 6, 1, 8, 8>}, {transform_indices = @transform_1, window_bounds = array<i64: 6, 8, 8>}, {transform_indices = @transform_2, window_bounds = array<i64: 1, 8, 128>}]} {
    %c0 = arith.constant 0 : index
    %c0_0 = arith.constant 0 : index
    %c0_1 = arith.constant 0 : index
    %c0_2 = arith.constant 0 : index
    %0 = vector.load %arg1[%c0, %c0_0, %c0_1, %c0_2] : memref<6x1x8x8xf32, #tpu.memory_space<vmem>>, vector<6x1x8x8xf32>
    %1 = vector.shape_cast %0 : vector<6x1x8x8xf32> to vector<6x8x8xf32>
    %c0_3 = arith.constant 0 : index
    %c0_4 = arith.constant 0 : index
    %c0_5 = arith.constant 0 : index
    %2 = vector.load %arg2[%c0_3, %c0_4, %c0_5] : memref<6x8x8xf32, #tpu.memory_space<vmem>>, vector<6x8x8xf32>
    %cst = arith.constant 0.000000e+00 : f32
    %3 = vector.broadcast %cst : f32 to vector<6x8x8xf32>
    %4 = arith.maximumf %1, %3 : vector<6x8x8xf32>
    %5 = math.absf %1 : vector<6x8x8xf32>
    %cst_6 = arith.constant 0.000000e+00 : f32
    %6 = vector.broadcast %cst_6 : f32 to vector<6x8x8xf32>
    %7 = arith.subf %6, %5 : vector<6x8x8xf32>
    %8 = math.exp %7 : vector<6x8x8xf32>
    %cst_7 = arith.constant 1.000000e+00 : f32
    %9 = vector.broadcast %cst_7 : f32 to vector<6x8x8xf32>
    %10 = arith.addf %9, %8 : vector<6x8x8xf32>
    %11 = math.log %10 : vector<6x8x8xf32>
    %12 = arith.addf %4, %11 : vector<6x8x8xf32>
    %cst_8 = arith.constant 1.000000e+02 : f32
    %13 = vector.broadcast %cst_8 : f32 to vector<6x8x8xf32>
    %14 = arith.minimumf %12, %13 : vector<6x8x8xf32>
    %15 = arith.mulf %2, %14 : vector<6x8x8xf32>
    %16 = vector.shape_cast %15 : vector<6x8x8xf32> to vector<1x6x8x8xf32>
    %cst_9 = arith.constant dense<0.000000e+00> : vector<1xf32>
    %17 = vector.multi_reduction <add>, %16, %cst_9 [1, 2, 3] : vector<1x6x8x8xf32> to vector<1xf32>
    %18 = vector.shape_cast %17 : vector<1xf32> to vector<1x1x1x1xf32>
    %19 = vector.extract %18[0, 0, 0, 0] : f32 from vector<1x1x1x1xf32>
    %cst_10 = arith.constant 1.000000e+00 : f32
    %20 = vector.broadcast %cst_10 : f32 to vector<1x8x128xf32>
    %21 = vector.broadcast %19 : f32 to vector<1x8x128xf32>
    %22 = arith.mulf %21, %20 : vector<1x8x128xf32>
    %c0_11 = arith.constant 0 : index
    %c0_12 = arith.constant 0 : index
    %c0_13 = arith.constant 0 : index
    %23 = vector.load %arg3[%c0_11, %c0_12, %c0_13] : memref<1x8x128xf32, #tpu.memory_space<vmem>>, vector<1x8x128xf32>
    tpu.vector_store %arg3[%c0_11, %c0_12, %c0_13], %22 {strides = array<i32>} : memref<1x8x128xf32, #tpu.memory_space<vmem>>, vector<1x8x128xf32>,
    return
  }
  func.func @transform_0(%arg0: i32) -> (i32, i32, i32, i32) {
    %c4_i32 = arith.constant 4 : i32
    %c0_i32 = arith.constant 0 : i32
    %c0_i32_0 = arith.constant 0 : i32
    %c0_i32_1 = arith.constant 0 : i32
    return %arg0, %c4_i32, %c0_i32, %c0_i32_0 : i32, i32, i32, i32
  }
  func.func @transform_1(%arg0: i32) -> (i32, i32, i32) {
    %c0_i32 = arith.constant 0 : i32
    %c0_i32_0 = arith.constant 0 : i32
    %c0_i32_1 = arith.constant 0 : i32
    return %arg0, %c0_i32, %c0_i32_0 : i32, i32, i32
  }
  func.func @transform_2(%arg0: i32) -> (i32, i32, i32) {
    %c0_i32 = arith.constant 0 : i32
    %c0_i32_0 = arith.constant 0 : i32
    %c0_i32_1 = arith.constant 0 : i32
    return %arg0, %c0_i32, %c0_i32_0 : i32, i32, i32
  }
}

</mosaic_0001>

<bundles_post_ra>
// kernel: tpu_custom_call.1
= control target key start
LH: loop header
LB: loop body
LE: loop exit
PB: predicated region body
PF: predicated region fallthrough
CT: control target
= control target key end

     0   :  { %s329_s0 = inlined_call_operand.vmem [shape: f32[6,9,8,8], index: 0, kind: input, shape index: {}]   ;;  %s330_s1 = inlined_call_operand.vmem [shape: f32[6,8,8], index: 1, kind: input, shape index: {}]   ;;  %s331_s2 = inlined_call_operand.hbm [shape: f32[1,8,128], index: 2, kind: output, shape index: {}]  }
   0x1   :  { %v189_v0 = vld [vmem:[%s329_s0 + $0x20] sm:$0xff]  ;;  %v270_v1 = vld [vmem:[%s329_s0 + $0x68] sm:$0xff]  ;;  %v275_v2 = vld [vmem:[%s329_s0 + $0xb0] sm:$0xff] }
   0x2   :  { %v280_v3 = vld [vmem:[%s329_s0 + $0xf8] sm:$0xff]  ;;  %v285_v4 = vld [vmem:[%s329_s0 + $0x140] sm:$0xff]  ;;  %v290_v5 = vld [vmem:[%s329_s0 + $0x188] sm:$0xff]  ;;  %v86_v6 = vand.u32 2147483647, %v189_v0 }
   0x3   :  { %v87_v7 = vand.u32 2147483647, %v270_v1  ;;  %v88_v8 = vand.u32 2147483647, %v275_v2  ;;  %v89_v9 = vand.u32 2147483647, %v280_v3 }
   0x4   :  { %v90_v10 = vand.u32 2147483647, %v285_v4  ;;  %v91_v11 = vand.u32 2147483647, %v290_v5  ;;  %v92_v12 = vsub.f32 0.0, %v86_v6 }
   0x5   :  { %v93_v13 = vsub.f32 0.0, %v87_v7  ;;  %v94_v14 = vsub.f32 0.0, %v88_v8  ;;  %v95_v15 = vsub.f32 0.0, %v89_v9 }
   0x6   :  { %7 = vsyncpa [#allocation4], 0  ;;  %v96_v16 = vsub.f32 0.0, %v90_v10  ;;  %v97_v17 = vsub.f32 0.0, %v91_v11  ;;  %v98_v18 = vmul.f32 1.442695, %v92_v12 }
   0x7   :  { %v100_v19 = vmul.f32 1.442695, %v93_v13  ;;  %v102_v20 = vmul.f32 1.442695, %v94_v14  ;;  %v104_v21 = vmul.f32 1.442695, %v95_v15 }
   0x8   :  { %198 = vpow2.f32 %v98_v18  ;;  %v106_v22 = vmul.f32 1.442695, %v96_v16  ;;  %v108_v23 = vmul.f32 1.442695, %v97_v17  ;;  %v80_v36 = vmax.f32 %v189_v0, 0.0  ;;  %v74_v50 = vld [vmem:[%s330_s1] sm:$0xff] }
   0x9   :  { %200 = vpow2.f32 %v100_v19  ;;  %v81_v38 = vmax.f32 %v270_v1, 0.0  ;;  %v82_v40 = vmax.f32 %v275_v2, 0.0  ;;  %v83_v43 = vmax.f32 %v280_v3, 0.0  ;;  %v75_v55 = vld [vmem:[%s330_s1 + $0x8] sm:$0xff]  ;;  %v76_v59 = vld [vmem:[%s330_s1 + $0x10] sm:$0xff]  ;;  %v77_v63 = vld [vmem:[%s330_s1 + $0x18] sm:$0xff] }
   0xa   :  { %202 = vpow2.f32 %v102_v20  ;;  %v84_v46 = vmax.f32 %v285_v4, 0.0  ;;  %v85_v51 = vmax.f32 %v290_v5, 0.0  ;;  %vm146_vm0 = vcmask 64512   ;;  %v78_v3 = vld [vmem:[%s330_s1 + $0x20] sm:$0xff]  ;;  %v79_v7 = vld [vmem:[%s330_s1 + $0x28] sm:$0xff]  ;;  %s248_s1 = smov [#allocation3]  }
   0xb   :  { %204 = vpow2.f32 %v104_v21  ;;  %s174_s4 = sshll.u32 %s248_s1, 4  ;;  %s176_s7 = sshll.u32 %s331_s2, 4  ;;  %s175_s4 = int_to_ptr.vmem [resolvable:$true] %s174_s4  ;;  %s177_s7 = int_to_ptr.hbm [resolvable:$true] %s176_s7 }
   0xc   :  { %206 = vpow2.f32 %v106_v22 }
   0xd   :  { %208 = vpow2.f32 %v108_v23 }
   0xe   :  { %v199_v24 = vpop.eup %198 }
   0xf   :  { %v201_v25 = vpop.eup %200  ;;  %v110_v26 = vadd.f32 1.0, %v199_v24 }
  0x10   :  { %v203_v27 = vpop.eup %202  ;;  %v111_v28 = vadd.f32 1.0, %v201_v25 }
  0x11   :  { %v205_v29 = vpop.eup %204  ;;  %v112_v30 = vadd.f32 1.0, %v203_v27  ;;  %210 = vlog2.f32 %v110_v26 }
  0x12   :  { %v207_v31 = vpop.eup %206  ;;  %v113_v32 = vadd.f32 1.0, %v205_v29  ;;  %212 = vlog2.f32 %v111_v28 }
  0x13   :  { %v209_v33 = vpop.eup %208  ;;  %v114_v34 = vadd.f32 1.0, %v207_v31  ;;  %214 = vlog2.f32 %v112_v30 }
  0x14   :  { %v115_v35 = vadd.f32 1.0, %v209_v33  ;;  %216 = vlog2.f32 %v113_v32 }
  0x15   :  { %218 = vlog2.f32 %v114_v34 }
  0x16   :  { %220 = vlog2.f32 %v115_v35 }
  0x17   :  { %v211_v37 = vpop.eup %210 }
  0x18   :  { %v213_v39 = vpop.eup %212  ;;  %v117_v41 = vmul.f32 0.6931472, %v211_v37 }
  0x19   :  { %v215_v42 = vpop.eup %214  ;;  %v119_v44 = vmul.f32 0.6931472, %v213_v39 }
  0x1a   :  { %v217_v45 = vpop.eup %216  ;;  %v121_v47 = vmul.f32 0.6931472, %v215_v42  ;;  %v128_v48 = vadd.f32 %v117_v41, %v80_v36 }
  0x1b   :  { %v219_v49 = vpop.eup %218  ;;  %v123_v52 = vmul.f32 0.6931472, %v217_v45  ;;  %v129_v53 = vadd.f32 %v119_v44, %v81_v38 }
  0x1c   :  { %v221_v54 = vpop.eup %220  ;;  %v125_v56 = vmul.f32 0.6931472, %v219_v49  ;;  %v130_v57 = vadd.f32 %v121_v47, %v82_v40  ;;  %v134_v58 = vmin.f32 %v128_v48, 100.0 }
  0x1d   :  { %v127_v60 = vmul.f32 0.6931472, %v221_v54  ;;  %v131_v61 = vadd.f32 %v123_v52, %v83_v43  ;;  %v135_v62 = vmin.f32 %v129_v53, 100.0 }
  0x1e   :  { %v132_v0 = vadd.f32 %v125_v56, %v84_v46  ;;  %v136_v1 = vmin.f32 %v130_v57, 100.0  ;;  %v140_v2 = vmul.f32 %v134_v58, %v74_v50 }
  0x1f   :  { %v133_v4 = vadd.f32 %v127_v60, %v85_v51  ;;  %v137_v5 = vmin.f32 %v131_v61, 100.0  ;;  %v141_v6 = vmul.f32 %v135_v62, %v75_v55 }
  0x20   :  { %v138_v8 = vmin.f32 %v132_v0, 100.0  ;;  %v142_v9 = vmul.f32 %v136_v1, %v76_v59  ;;  %v147_v10 = vsel %vm146_vm0, %v140_v2, 0.0 }
  0x21   :  { %v139_v11 = vmin.f32 %v133_v4, 100.0  ;;  %v143_v12 = vmul.f32 %v137_v5, %v77_v63  ;;  %v148_v13 = vsel %vm146_vm0, %v141_v6, 0.0 }
  0x22   :  { %v144_v14 = vmul.f32 %v138_v8, %v78_v3  ;;  %v149_v15 = vadd.f32 %v148_v13, %v147_v10  ;;  %v150_v16 = vsel %vm146_vm0, %v142_v9, 0.0 }
  0x23   :  { %v145_v17 = vmul.f32 %v139_v11, %v79_v7  ;;  %v152_v18 = vsel %vm146_vm0, %v143_v12, 0.0 }
  0x24   :  { %v151_v19 = vadd.f32 %v150_v16, %v149_v15  ;;  %v154_v20 = vsel %vm146_vm0, %v144_v14, 0.0 }
  0x25   :  { %v156_v22 = vsel %vm146_vm0, %v145_v17, 0.0 }
  0x26   :  { %v153_v21 = vadd.f32 %v152_v18, %v151_v19 }
  0x28   :  { %v155_v23 = vadd.f32 %v154_v20, %v153_v21 }
  0x2a   :  { %v157_v24 = vadd.f32 %v156_v22, %v155_v23 }
  0x2c   :  { %158 = vadd.xlane.f32.xlu0 %v157_v24 }
  0x9f   :  { %v159_v25 = vpop.xlane.xlu0 %158 }
  0xa0   :  { %v160_v26 = vrot.slane %v159_v25, 4 }
  0xa2   :  { %v161_v27 = vadd.f32 %v160_v26, %v159_v25 }
  0xa4   :  { %v162_v28 = vrot.slane %v161_v27, 2 }
  0xa6   :  { %v163_v29 = vadd.f32 %v162_v28, %v161_v27 }
  0xa8   :  { %v164_v30 = vrot.slane %v163_v29, 1 }
  0xaa   :  { %v165_v31 = vadd.f32 %v164_v30, %v163_v29 }
  0xac   :  { %195 = vpush %v165_v31 }
  0xdd   :  { %s196_s8 = spop %195 }
  0xde   :  { %v167_v32 = vstv %s196_s8 }
  0xdf   :  { %168 = vst [vmem:[#allocation3] sm:$0xff] %v167_v32 }
  0xe0   :  { %179 = dma.vmem_to_hbm [thread:$0]  %s175_s4, 128, %s177_s7, [#allocation4]  }
  0xe1   :  { %246 = dma.done.wait [#allocation4], 128  }
  0xe2   :  { %247 = vsyncadd [#allocation4], 4294967168 }
  0xe3   :  { %184 = vsyncpa [#allocation4], 1 }

</bundles_post_ra>
